<compile_context>
chip_gen: v6e
topology: v6e:2x2x1
jax: 0.10.0
libtpu: 0.0.40
codegen_flags: <defaults>
</compile_context>

<pallas_src>
import functools

import jax
import jax.numpy as jnp
from jax.experimental import pallas as pl
from jax.experimental.pallas import tpu as pltpu


# ----------------------------------------------------------------------------
# Kernels
# ----------------------------------------------------------------------------

def _mlp_kernel_acc(x_ref, wg_ref, wu_ref, wd_ref, o_ref, acc_ref, *, ew_dtype):
    """Variant with a separate fp32 accumulator scratch (bf16 / narrow output)."""
    i = pl.program_id(1)
    x = x_ref[...]
    g = jnp.dot(x, wg_ref[...], preferred_element_type=jnp.float32)
    u = jnp.dot(x, wu_ref[...], preferred_element_type=jnp.float32)
    if jnp.dtype(ew_dtype) != jnp.dtype(jnp.float32):
        g = g.astype(ew_dtype)
        u = u.astype(ew_dtype)
    h = (g * jax.nn.sigmoid(g)) * u                     # SiLU(gate) * up
    partial = jnp.dot(h.astype(wd_ref.dtype), wd_ref[...],
                      preferred_element_type=jnp.float32)

    @pl.when(i == 0)
    def _():
        acc_ref[...] = partial                          # direct init

    @pl.when(i > 0)
    def _():
        acc_ref[...] += partial

    @pl.when(i == pl.num_programs(1) - 1)
    def _():
        o_ref[...] = acc_ref[...].astype(o_ref.dtype)


def _mlp_kernel_noacc(x_ref, wg_ref, wu_ref, wd_ref, o_ref, *, ew_dtype):
    """f32 variant: accumulate directly into the resident fp32 output block,
    saving tm*H*4 bytes of VMEM (the main tiling lever on v7x)."""
    i = pl.program_id(1)
    x = x_ref[...]
    g = jnp.dot(x, wg_ref[...], preferred_element_type=jnp.float32)
    u = jnp.dot(x, wu_ref[...], preferred_element_type=jnp.float32)
    if jnp.dtype(ew_dtype) != jnp.dtype(jnp.float32):
        g = g.astype(ew_dtype)
        u = u.astype(ew_dtype)
    h = (g * jax.nn.sigmoid(g)) * u
    partial = jnp.dot(h.astype(wd_ref.dtype), wd_ref[...],
                      preferred_element_type=jnp.float32)

    @pl.when(i == 0)
    def _():
        o_ref[...] = partial

    @pl.when(i > 0)
    def _():
        o_ref[...] += partial


# ----------------------------------------------------------------------------
# Tiling / hardware helpers
# ----------------------------------------------------------------------------

def _round_up(x, m):
    return ((x + m - 1) // m) * m


def _round_down(x, m):
    return (x // m) * m


def _chip_info():
    """Returns (vmem_capacity_bytes, tpu_generation)."""
    gen = 6
    try:
        kind = jax.devices()[0].device_kind.lower()
        for g in (7, 6, 5, 4, 3, 2):
            if ("v%d" % g) in kind:
                gen = g
                break
    except Exception:
        pass
    vmem = None
    try:
        info = pltpu.get_tpu_info()
        for attr in ("vmem_capacity_bytes", "vmem_bytes"):
            v = getattr(info, attr, None)
            if v:
                vmem = int(v)
                break
    except Exception:
        pass
    if vmem is None:
        vmem = (64 if gen >= 7 else 128) * 1024 * 1024
    return vmem, gen


def _ti_options(I, cap):
    """Candidate intermediate tile sizes: the full extent (always legal) and
    every 128-aligned divisor of I up to cap. Falls back to `cap` (requires
    zero-padding I) only if nothing aligned exists."""
    opts = set()
    if I <= cap:
        opts.add(I)
    t = 128
    while t <= min(cap, I):
        if I % t == 0:
            opts.add(t)
        t += 128
    if not opts:
        opts.add(cap)
    return sorted(opts, reverse=True)


def _select_tiles(M, H, I, dtype, gen, vmem_limit_bytes, use_acc_scratch,
                  ew_bytes, weight_buffers):
    """Pick (tm, ti) from an explicit VMEM byte model + per-chip roofline."""
    b = jnp.dtype(dtype).itemsize
    sublane = 8 if b >= 4 else max(8, 32 // b)
    budget = int(vmem_limit_bytes * 0.8)

    # Per-TC ridge (flops/byte ~ tm) so weight streaming stays hidden.
    tm_target = {5: 384, 6: 1024, 7: 640}.get(gen, 512)
    # Smaller weight slices on VMEM-tight v7x so the freed bytes buy tm.
    ti_cap = 256 if gen >= 7 else 512

    best = None
    for ti in _ti_options(I, ti_cap):
        # Double(/triple)-buffered gate + up + down weight slices.
        w_fixed = weight_buffers * 3 * ti * H * b
        # Bytes that scale with tm: x + out (double buffered), fp32 acc,
        # fp32 gate/up matmul results, activation temp + its cast for down dot.
        per_tm = (4 * H * b
                  + (4 * H if use_acc_scratch else 0)
                  + 2 * ti * 4
                  + ti * (ew_bytes + b))
        room = budget - w_fixed
        tm_max = room // per_tm if room > 0 else 0
        tm = min(tm_target, tm_max)
        if tm >= 128:
            tm = _round_down(tm, 128)        # keep MXU row groups full
        else:
            tm = max(sublane, _round_down(max(tm, sublane), sublane))
        eff_tm = min(tm, _round_up(M, sublane))
        key = (eff_tm, ti)
        if best is None or key > best[0]:
            best = (key, tm, ti)
    _, tm, ti = best

    if tm >= M:
        if gen >= 7 and M >= 256:
            # v7x has 2 TensorCores: keep >= 2 tiles on the parallel m axis.
            tm = max(128, _round_down((M + 1) // 2, 128))
        else:
            tm = M
    return int(tm), int(ti)


# ----------------------------------------------------------------------------
# Wrapper
# ----------------------------------------------------------------------------

def llama_mlp(x, wg, wu, wd, *, tm=None, ti=None, vmem_limit_bytes=None,
              weight_buffers=2, elementwise_dtype=None):
    """x: (B, S, H); wg/wu: (H, I); wd: (I, H). Returns (B, S, H).

    weight_buffers: pipeline depth for the weight streams (3 can help on v6e
    if xprof shows exposed DMA; keep 2 on v7x/v5e).
    """
    B, S, H = x.shape
    Hg, I = wg.shape
    assert Hg == H and wu.shape == (H, I) and wd.shape == (I, H)
    M = B * S
    x2d = x.reshape(M, H)

    dtype = x.dtype
    itemsize = jnp.dtype(dtype).itemsize

    vmem_cap, gen = _chip_info()
    if vmem_limit_bytes is None:
        # Above the default scoped limit, with headroom below physical VMEM
        # (~56 MiB on v7x, ~112 MiB on v5e/v6e).
        vmem_limit_bytes = int(vmem_cap * 7 // 8)

    # f32 path accumulates straight into the fp32 output block.
    use_acc_scratch = jnp.dtype(dtype) != jnp.dtype(jnp.float32)

    if elementwise_dtype is None:
        # bf16 VPU/EUP exists on v6e/v7x; v5e would only add conversions.
        if jnp.dtype(dtype) == jnp.dtype(jnp.bfloat16) and gen != 5:
            elementwise_dtype = jnp.bfloat16
        else:
            elementwise_dtype = jnp.float32
    ew_bytes = jnp.dtype(elementwise_dtype).itemsize

    auto_tm, auto_ti = _select_tiles(M, H, I, dtype, gen, vmem_limit_bytes,
                                     use_acc_scratch, ew_bytes, weight_buffers)
    if tm is None:
        tm = auto_tm
    if ti is None:
        ti = auto_ti
    tm = int(min(tm, M))
    ti = int(min(ti, _round_up(I, 128)))

    # Ragged edges: zero-pad instead of asserting. Zero x rows and zero
    # gate/up columns (and matching zero down-proj rows) contribute nothing.
    M_pad = _round_up(M, tm)
    I_pad = _round_up(I, ti)
    if M_pad > M:
        x2d = jnp.pad(x2d, ((0, M_pad - M), (0, 0)))
    wg_p, wu_p, wd_p = wg, wu, wd
    if I_pad > I:
        # TODO(synk): in production, pad/layout weights once per layer, not per call.
        wg_p = jnp.pad(wg, ((0, 0), (0, I_pad - I)))
        wu_p = jnp.pad(wu, ((0, 0), (0, I_pad - I)))
        wd_p = jnp.pad(wd, ((0, I_pad - I), (0, 0)))

    grid = (M_pad // tm, I_pad // ti)

    if use_acc_scratch:
        kernel = functools.partial(_mlp_kernel_acc, ew_dtype=elementwise_dtype)
        scratch_shapes = [pltpu.VMEM((tm, H), jnp.float32)]
    else:
        kernel = functools.partial(_mlp_kernel_noacc, ew_dtype=elementwise_dtype)
        scratch_shapes = []

    def _wspec(shape, index_map):
        if weight_buffers != 2:
            return pl.BlockSpec(shape, index_map,
                                pipeline_mode=pl.Buffered(weight_buffers))
        return pl.BlockSpec(shape, index_map)

    in_specs = [
        pl.BlockSpec((tm, H), lambda m, i: (m, 0)),      # x tile
        _wspec((H, ti), lambda m, i: (0, i)),            # gate_proj slice
        _wspec((H, ti), lambda m, i: (0, i)),            # up_proj slice
        _wspec((ti, H), lambda m, i: (i, 0)),            # down_proj slice
    ]
    out_specs = pl.BlockSpec((tm, H), lambda m, i: (m, 0))

    n_m_tiles = M_pad // tm
    w_stream_bytes = 3 * H * I_pad * itemsize * n_m_tiles
    io_bytes = 2 * M_pad * H * itemsize
    cost = pl.CostEstimate(
        flops=6 * M_pad * H * I_pad,          # 3 matmuls of M x H x I
        transcendentals=M_pad * I_pad,        # sigmoid
        bytes_accessed=int(w_stream_bytes + io_bytes),
    )

    out2d = pl.pallas_call(
        kernel,
        out_shape=jax.ShapeDtypeStruct((M_pad, H), dtype),
        grid_spec=pltpu.PrefetchScalarGridSpec(
            num_scalar_prefetch=0,
            grid=grid,
            in_specs=in_specs,
            out_specs=out_specs,
            scratch_shapes=scratch_shapes,
        ),
        compiler_params=pltpu.CompilerParams(
            dimension_semantics=("parallel", "arbitrary"),
            vmem_limit_bytes=int(vmem_limit_bytes),
        ),
        cost_estimate=cost,
    )(x2d, wg_p, wu_p, wd_p)

    return out2d[:M].reshape(B, S, H)


def _reference(x, wg, wu, wd):
    g = x @ wg
    u = x @ wu
    h = (g * jax.nn.sigmoid(g)) * u
    return h @ wd


if __name__ == "__main__":
    # Small, module-consistent shapes.
    batch, seq = 2, 8
    hidden_size = 128
    intermediate_size = 256

    key = jax.random.PRNGKey(0)
    kx, kg, ku, kd, kx3, kg3, ku3, kd3 = jax.random.split(key, 8)

    x = jax.random.normal(kx, (batch, seq, hidden_size), dtype=jnp.float32)
    # Deterministic synthetic weights (transposed vs torch Linear.weight layout).
    wg = jax.random.normal(kg, (hidden_size, intermediate_size), dtype=jnp.float32) * 0.02
    wu = jax.random.normal(ku, (hidden_size, intermediate_size), dtype=jnp.float32) * 0.02
    wd = jax.random.normal(kd, (intermediate_size, hidden_size), dtype=jnp.float32) * 0.02

    # --- Test 1: float32, forced small tiles to exercise m-tiling and the
    #             reduction accumulation over the intermediate axis.
    out = llama_mlp(x, wg, wu, wd, tm=8, ti=128)
    out = jax.block_until_ready(out)
    ref = _reference(x, wg, wu, wd)
    assert out.shape == (batch, seq, hidden_size)
    assert jnp.allclose(out, ref, atol=2e-4, rtol=2e-4), "f32 mismatch vs reference"

    # --- Test 2: bfloat16 (production dtype), automatic byte-model tiling.
    xb, wgb, wub, wdb = (a.astype(jnp.bfloat16) for a in (x, wg, wu, wd))
    out_bf16 = llama_mlp(xb, wgb, wub, wdb)
    out_bf16 = jax.block_until_ready(out_bf16)
    ref_bf16 = _reference(xb.astype(jnp.float32), wgb.astype(jnp.float32),
                          wub.astype(jnp.float32), wdb.astype(jnp.float32))
    assert out_bf16.shape == (batch, seq, hidden_size)
    assert jnp.allclose(out_bf16.astype(jnp.float32), ref_bf16,
                        atol=1e-2, rtol=5e-2), "bf16 mismatch vs reference"

    # --- Test 3: ragged M (batch*seq=14) and ragged I (192) -> padding path.
    x3 = jax.random.normal(kx3, (2, 7, hidden_size), dtype=jnp.float32)
    wg3 = jax.random.normal(kg3, (hidden_size, 192), dtype=jnp.float32) * 0.02
    wu3 = jax.random.normal(ku3, (hidden_size, 192), dtype=jnp.float32) * 0.02
    wd3 = jax.random.normal(kd3, (192, hidden_size), dtype=jnp.float32) * 0.02
    out3 = llama_mlp(x3, wg3, wu3, wd3, tm=8, ti=128)
    out3 = jax.block_until_ready(out3)
    ref3 = _reference(x3, wg3, wu3, wd3)
    assert out3.shape == (2, 7, hidden_size)
    assert jnp.allclose(out3, ref3, atol=2e-4, rtol=2e-4), "ragged mismatch vs reference"

    print("KERNEL_OK")
</pallas_src>

<mosaic_0001>
module attributes {stable_mosaic.version = 11 : i64} {
  func.func @_mlp_kernel_noacc(%arg0: i32, %arg1: i32, %arg2: memref<8x128xf32, #tpu.memory_space<vmem>>, %arg3: memref<128x128xf32, #tpu.memory_space<vmem>>, %arg4: memref<128x128xf32, #tpu.memory_space<vmem>>, %arg5: memref<128x128xf32, #tpu.memory_space<vmem>>, %arg6: memref<8x128xf32, #tpu.memory_space<vmem>>) attributes {dimension_semantics = [#tpu.dimension_semantics<parallel>, #tpu.dimension_semantics<arbitrary>], iteration_bounds = array<i64: 2, 2>, scalar_prefetch = 0 : i64, scratch_operands = 0 : i64, tpu.core_type = #tpu.core_type<tc>, window_params = [{transform_indices = @transform_0, window_bounds = array<i64: 8, 128>}, {transform_indices = @transform_1, window_bounds = array<i64: 128, 128>}, {transform_indices = @transform_2, window_bounds = array<i64: 128, 128>}, {transform_indices = @transform_3, window_bounds = array<i64: 128, 128>}, {transform_indices = @transform_4, window_bounds = array<i64: 8, 128>}]} {
    %c0 = arith.constant 0 : index
    %c0_0 = arith.constant 0 : index
    %0 = vector.load %arg2[%c0, %c0_0] : memref<8x128xf32, #tpu.memory_space<vmem>>, vector<8x128xf32>
    %c0_1 = arith.constant 0 : index
    %c0_2 = arith.constant 0 : index
    %1 = vector.load %arg3[%c0_1, %c0_2] : memref<128x128xf32, #tpu.memory_space<vmem>>, vector<128x128xf32>
    %cst = arith.constant dense<0.000000e+00> : vector<8x128xf32>
    %2 = tpu.matmul %0, %1, %cst {dimension_numbers = #tpu.dot_dimension_numbers<[1], [0], [0], [1], [0, 0, 1, 1], [], []>} : vector<8x128xf32>, vector<128x128xf32>, vector<8x128xf32> -> vector<8x128xf32>
    %c0_3 = arith.constant 0 : index
    %c0_4 = arith.constant 0 : index
    %3 = vector.load %arg4[%c0_3, %c0_4] : memref<128x128xf32, #tpu.memory_space<vmem>>, vector<128x128xf32>
    %cst_5 = arith.constant dense<0.000000e+00> : vector<8x128xf32>
    %4 = tpu.matmul %0, %3, %cst_5 {dimension_numbers = #tpu.dot_dimension_numbers<[1], [0], [0], [1], [0, 0, 1, 1], [], []>} : vector<8x128xf32>, vector<128x128xf32>, vector<8x128xf32> -> vector<8x128xf32>
    %5 = arith.negf %2 : vector<8x128xf32>
    %6 = math.exp %5 : vector<8x128xf32>
    %cst_6 = arith.constant 1.000000e+00 : f32
    %7 = vector.broadcast %cst_6 : f32 to vector<8x128xf32>
    %8 = arith.addf %7, %6 : vector<8x128xf32>
    %9 = arith.divf %7, %8 : vector<8x128xf32>
    %10 = arith.mulf %2, %9 : vector<8x128xf32>
    %11 = arith.mulf %10, %4 : vector<8x128xf32>
    %c0_7 = arith.constant 0 : index
    %c0_8 = arith.constant 0 : index
    %12 = vector.load %arg5[%c0_7, %c0_8] : memref<128x128xf32, #tpu.memory_space<vmem>>, vector<128x128xf32>
    %cst_9 = arith.constant dense<0.000000e+00> : vector<8x128xf32>
    %13 = tpu.matmul %11, %12, %cst_9 {dimension_numbers = #tpu.dot_dimension_numbers<[1], [0], [0], [1], [0, 0, 1, 1], [], []>} : vector<8x128xf32>, vector<128x128xf32>, vector<8x128xf32> -> vector<8x128xf32>
    %c0_i32 = arith.constant 0 : i32
    %14 = arith.cmpi eq, %arg1, %c0_i32 : i32
    %15 = arith.extui %14 : i1 to i32
    %c0_i32_10 = arith.constant 0 : i32
    %16 = arith.cmpi ne, %15, %c0_i32_10 : i32
    scf.if %16 {
      %c0_13 = arith.constant 0 : index
      %c0_14 = arith.constant 0 : index
      %20 = vector.load %arg6[%c0_13, %c0_14] : memref<8x128xf32, #tpu.memory_space<vmem>>, vector<8x128xf32>
      tpu.vector_store %arg6[%c0_13, %c0_14], %13 {strides = array<i32>} : memref<8x128xf32, #tpu.memory_space<vmem>>, vector<8x128xf32>,
    } else {
    }
    %c0_i32_11 = arith.constant 0 : i32
    %17 = arith.cmpi sgt, %arg1, %c0_i32_11 : i32
    %18 = arith.extui %17 : i1 to i32
    %c0_i32_12 = arith.constant 0 : i32
    %19 = arith.cmpi ne, %18, %c0_i32_12 : i32
    scf.if %19 {
      %c0_13 = arith.constant 0 : index
      %c0_14 = arith.constant 0 : index
      %20 = vector.load %arg6[%c0_13, %c0_14] : memref<8x128xf32, #tpu.memory_space<vmem>>, vector<8x128xf32>
      %21 = arith.addf %20, %13 : vector<8x128xf32>
      %c0_15 = arith.constant 0 : index
      %c0_16 = arith.constant 0 : index
      %22 = vector.load %arg6[%c0_15, %c0_16] : memref<8x128xf32, #tpu.memory_space<vmem>>, vector<8x128xf32>
      tpu.vector_store %arg6[%c0_15, %c0_16], %21 {strides = array<i32>} : memref<8x128xf32, #tpu.memory_space<vmem>>, vector<8x128xf32>,
    } else {
    }
    return
  }
  func.func @transform_0(%arg0: i32, %arg1: i32) -> (i32, i32) {
    %c0_i32 = arith.constant 0 : i32
    %c0_i32_0 = arith.constant 0 : i32
    return %arg0, %c0_i32 : i32, i32
  }
  func.func @transform_1(%arg0: i32, %arg1: i32) -> (i32, i32) {
    %c0_i32 = arith.constant 0 : i32
    %c0_i32_0 = arith.constant 0 : i32
    return %c0_i32, %arg1 : i32, i32
  }
  func.func @transform_2(%arg0: i32, %arg1: i32) -> (i32, i32) {
    %c0_i32 = arith.constant 0 : i32
    %c0_i32_0 = arith.constant 0 : i32
    return %c0_i32, %arg1 : i32, i32
  }
  func.func @transform_3(%arg0: i32, %arg1: i32) -> (i32, i32) {
    %c0_i32 = arith.constant 0 : i32
    %c0_i32_0 = arith.constant 0 : i32
    return %arg1, %c0_i32 : i32, i32
  }
  func.func @transform_4(%arg0: i32, %arg1: i32) -> (i32, i32) {
    %c0_i32 = arith.constant 0 : i32
    %c0_i32_0 = arith.constant 0 : i32
    return %arg0, %c0_i32 : i32, i32
  }
}

</mosaic_0001>

<bundles_post_ra>
// kernel: tpu_custom_call.1
= control target key start
LH: loop header
LB: loop body
LE: loop exit
PB: predicated region body
PF: predicated region fallthrough
CT: control target
= control target key end

     0   :  { %s1775_s0 = inlined_call_operand.hbm [shape: f32[16,128], index: 0, kind: input, shape index: {}]   ;;  %s1776_s1 = inlined_call_operand.hbm [shape: f32[128,256], index: 1, kind: input, shape index: {}]   ;;  %s1777_s2 = inlined_call_operand.hbm [shape: f32[128,256], index: 2, kind: input, shape index: {}]   ;;  %s1778_s3 = inlined_call_operand.hbm [shape: f32[256,128], index: 3, kind: input, shape index: {}]   ;;  %s1779_s4 = inlined_call_operand.hbm [shape: f32[16,128], index: 4, kind: output, shape index: {}]  }
   0x1   :  { %1799 = sst [smem:[#allocation24_spill]] %s1775_s0 }
   0x2   :  { %1800 = sst [smem:[#allocation25_spill]] %s1776_s1 }
   0x3   :  { %1801 = sst [smem:[#allocation26_spill]] %s1777_s2 }
   0x4   :  { %1802 = sst [smem:[#allocation27_spill]] %s1779_s4 }
   0x5   :  { %9 = vsyncpa [#allocation3], 0 }
   0x6   :  { %11 = vsyncpa [#allocation3 + $0x1], 0 }
   0x7   :  { %12 = vsyncpa [#allocation6], 0 }
   0x8   :  { %14 = vsyncpa [#allocation6 + $0x1], 0 }
   0x9   :  { %15 = vsyncpa [#allocation9], 0 }
   0xa   :  { %17 = vsyncpa [#allocation9 + $0x1], 0 }
   0xb   :  { %18 = vsyncpa [#allocation4], 0 }
   0xc   :  { %20 = vsyncpa [#allocation4 + $0x1], 0  ;;  %s1367_s15 = smov 0   ;;  %s1369_s16 = smov 0  }
   0xd   :  { %s1371_s17 = smov 0   ;;  %s1373_s18 = smov 0  }
   0xe   :  { %s1375_s19 = smov 0   ;;  %s1377_s20 = smov 0  }
   0xf   :  { %s1379_s21 = smov 0   ;;  %s1381_s22 = smov 0  }
  0x10   :  { %s1383_s23 = smov 0   ;;  %s1385_s24 = smov 0  }
  0x11   :  { %s1387_s25 = smov 0  }
  0x12 LB: > { %1803 = sst [smem:[#allocation15_spill]] %s1302_s18  ;;  %p53_p0 = scmp.eq.s32.totalorder %s1330_s25, 0  ;;  %s1330_s25 = sphi %s1387_s25, %s26_s25   ;;  %s1326_s24 = sphi %s1385_s24, %s1845_s24   ;;  %s1322_s23 = sphi %s1383_s23, %s1853_s23   ;;  %s1318_s22 = sphi %s1381_s22, %s1843_s22   ;;  %s1314_s21 = sphi %s1379_s21, %s1852_s21   ;;  %s1310_s20 = sphi %s1377_s20, %s1851_s20   ;;  %s1306_s19 = sphi %s1375_s19, %s1850_s19   ;;  %s1302_s18 = sphi %s1373_s18, %s1849_s18   ;;  %s1298_s17 = sphi %s1371_s17, %s1848_s17   ;;  %s1294_s16 = sphi %s1369_s16, %s1847_s16   ;;  %s1290_s15 = sphi %s1367_s15, %s1846_s15  }
  0x13   : > { %1804 = sst [smem:[#allocation16_spill]] %s1318_s22  ;;  %p78_p1 = scmp.ne.s32.totalorder %s1298_s17, %s1294_s16 }
  0x14   : > { %1805 = sst [smem:[#allocation17_spill]] %s1326_s24  ;;  %p1787_p2 = scmp.lt.s32.totalorder %s1330_s25, 4 }
  0x15   : > { %s204_s27 = sand.u32 1, %s1330_s25   ;;  %p80_p3 = por %p78_p1, %p53_p0 }
  0x16   : > { %s1780_s28 = sand.u32 1, %s1298_s17   ;;  %s788_s29 = sshll.u32 %s1322_s23, 7 }
  0x17   : > { %s1434_s30 = sshll.u32 %s1780_s28, 7  ;;  %s1806_s1 = sld [smem:[#allocation25_spill]] }
  0x18   : > { %p1443_p4 = pnand %p1787_p2, %p80_p3  ;;  %s208_s9 = scalar_lea.vmem [#allocation5], %s1434_s30 }
  0x19   : > { %s214_s10 = sshll.u32 %s208_s9, 4  ;;  %s1448_s11 = scalar_lea.sflag [#allocation6], %s204_s27  ;;  %s215_s10 = int_to_ptr.vmem [resolvable:$true] %s214_s10 }
  0x1a   : > { %p1786_p5 = pneg %p1443_p4  ;;  %s1103_s12 = scalar_lea.vmem %s215_s10, 2048 }
  0x1b   : > { %p1104_p6 = scmp.ne.s32.totalorder %s215_s10, %s1103_s12  ;;  %s1332_s13 = smov [#allocation5]  }
  0x1c   : > { %s1108_s14 = sshll.u32 %s1332_s13, 4  ;;  %s1109_s14 = int_to_ptr.vmem [resolvable:$false] %s1108_s14 }
  0x1d   : > { %s213_s7 = scalar_lea.hbm %s1806_s1, %s788_s29  ;;  %p1106_p7 = pnand %p1104_p6, %p1786_p5 }
  0x1e   : > { %s1110_s5 = scalar_lea.vmem %s1109_s14, 4096  ;;  %p1111_p9 = scmp.lt.s32.totalorder %s215_s10, %s1109_s14 }
  0x1f   : > { %p1107_p8 = pneg %p1106_p7  ;;  %p1112_p10 = scmp.lt.s32.totalorder %s1110_s5, %s1103_s12 }
  0x21   : > { %p1113_p11 = por %p1112_p10, %p1111_p9 }
  0x23   : > { %p1114_p12 = pnand %p1113_p11, %p1107_p8 }
  0x25   : > { %1117 = shalt.err (!%p1114_p12)
}
  0x26   : > { %s1781_s6 = smov 256   ;;  %s1782_s27 = smov 128  }
  0x27   : > { %s1784_s9 = smov 8   ;;  %s1808_s2 = sld [smem:[#allocation26_spill]] }
  0x28   : > { %980 = dma.hbm_to_vmem [thread:$0]  (!%p1443_p4), %s213_s7, 2048, %s215_s10, %s1448_s11, %s1781_s6, %s1782_s27, %s1784_s9  }
  0x29   : > { %p794_p13 = scmp.ge.s32.totalorder %s1330_s25, 1  ;;  %p263_p1 = scmp.lt.s32.totalorder %s1330_s25, 5 }
  0x2a   : > { %s1475_s28 = sadd.s32 4294967295, %s1330_s25   ;;  %s782_s26 = sadd.s32 4294967294, %s1330_s25  }
  0x2b   : > { %p1470_p3 = pnand %p794_p13, %p263_p1  ;;  %s35_s7 = sadd.s32 1, %s1322_s23 }
  0x2c   : > { %s38_s10 = sadd.s32 1, %s1326_s24  ;;  %p36_p6 = scmp.ge.s32.totalorder %s35_s7, 2 }
  0x2d   : > { %s1466_s14 = scalar_lea.hbm %s1808_s2, %s788_s29  ;;  %s45_s29 = sadd.s32 1, %s1310_s20 }
  0x2e   : > { %p52_p7 = scmp.ne.s32.totalorder %s1310_s20, %s1306_s19  ;;  %p58_p8 = scmp.ne.s32.totalorder %s1306_s19, %s1302_s18 }
  0x2f   : > { %s1855_s7 = smov (%p36_p6, %s35_s7), 0  ;;  %s1857_s10 = smov (!%p36_p6, %s38_s10), %s1326_s24 }
  0x30   : > { %1810 = sst [smem:[#allocation18_spill]] %s1855_s7  ;;  %p1493_p9 = por %p53_p0, %p52_p7 }
  0x31   : > { %p59_p10 = scmp.eq.s32.totalorder %s1475_s28, 0  ;;  %p40_p11 = scmp.ge.s32.totalorder %s1857_s10, 2 }
  0x32   : > { %s68_s13 = ssub.s32 %s1322_s23, %s1855_s7  ;;  %s1814_s27 = sadd.s32 1, %s1298_s17 }
  0x33   : > { %p1503_p12 = por %p59_p10, %p58_p8  ;;  %p69_p13 = scmp.eq.s32.totalorder %s68_s13, 0 }
  0x34   : > { %s1859_s10 = smov (%p40_p11, %s1857_s10), 0  ;;  %p84_p0 = scmp.ne.s32.totalorder %s1294_s16, %s1290_s15 }
  0x35   : > { %s1812_s6 = scalar_select %p1503_p12, 1, 0 }
  0x36   : > { %1813 = sst [smem:[#allocation19_spill]] %s1859_s10  ;;  %s42_s1 = ssub.s32 %s1326_s24, %s1859_s10 }
  0x37   : > { %s1512_s9 = scalar_select %p69_p13, %s1298_s17, %s1814_s27  }
  0x38   : > { %p43_p1 = scmp.eq.s32.totalorder %s42_s1, 0  ;;  %p160_p6 = scmp.eq.s32.totalorder %s1475_s28, 3 }
  0x39   : > { %1815 = sst [smem:[#allocation20_spill]] %s1512_s9  ;;  %p1519_p5 = por %p84_p0, %p59_p10 }
  0x3a   : > { %p166_p2 = scmp.eq.s32.totalorder %s782_s26, 3  ;;  %p1529_p11 = por %p160_p6, %p52_p7 }
  0x3b   : > { %s1816_s2 = scalar_select %p1519_p5, 1, 0 }
  0x3c   : > { %s1524_s7 = scalar_select %p43_p1, %s1310_s20, %s45_s29  }
  0x3d   : > { %s1818_s13 = scalar_select %p1529_p11, 1, 0 }
  0x3e   : > { %1817 = sst [smem:[#allocation21_spill]] %s1524_s7  ;;  %p1536_p13 = por %p166_p2, %p58_p8 }
  0x3f   : > { %1819 = sst [smem:[#allocation22_spill]] %s1818_s13  ;;  %s186_s15 = sand.u32 1, %s1310_s20  }
  0x40   : > { %s1820_s27 = scalar_select %p1536_p13, 1, 0 }
  0x41   : > { %s786_s1 = sshll.u32 %s1326_s24, 7  ;;  %s785_s10 = sshll.u32 %s186_s15, 3 }
  0x42   : > { %1821 = sst [smem:[#allocation23_spill]] %s1820_s27  ;;  %s190_s26 = scalar_lea.vmem [#allocation2], %s785_s10 }
  0x43   : > { %s1822_s0 = sld [smem:[#allocation24_spill]]  ;;  %s197_s29 = sshll.u32 %s190_s26, 4  ;;  %s198_s29 = int_to_ptr.vmem [resolvable:$true] %s197_s29 }
  0x44   : > { %p1823_p10 = scmp.lt.s32.totalorder %s1330_s25, 4  ;;  %s228_s18 = scalar_lea.vmem [#allocation7], %s1434_s30 }
  0x45   : > { %s234_s13 = sshll.u32 %s228_s18, 4  ;;  %s187_s27 = scalar_lea.sflag [#allocation3], %s186_s15  ;;  %s235_s13 = int_to_ptr.vmem [resolvable:$true] %s234_s13 }
  0x46   : > { %p1549_p7 = pnand %p1823_p10, %p1493_p9  ;;  %s1131_s24 = scalar_lea.vmem %s198_s29, 128 }
  0x47   : > { %p1132_p8 = scmp.ne.s32.totalorder %s198_s29, %s1131_s24  ;;  %s1336_s4 = smov [#allocation2]  }
  0x48   : > { %p1120_p2 = pneg %p1549_p7  ;;  %s1136_s9 = sshll.u32 %s1336_s4, 4  ;;  %s1137_s9 = int_to_ptr.vmem [resolvable:$false] %s1136_s9 }
  0x49   : > { %s195_s22 = scalar_lea.hbm %s1822_s0, %s786_s1  ;;  %s1138_s10 = scalar_lea.vmem %s1137_s9, 256 }
  0x4a   : > { %p1134_p0 = pnand %p1132_p8, %p1120_p2  ;;  %p1139_p6 = scmp.lt.s32.totalorder %s198_s29, %s1137_s9 }
  0x4b   : > { %p1140_p9 = scmp.lt.s32.totalorder %s1138_s10, %s1131_s24 }
  0x4c   : > { %p1135_p1 = pneg %p1134_p0 }
  0x4d   : > { %p1141_p10 = por %p1140_p9, %p1139_p6 }
  0x4f   : > { %p1142_p13 = pnand %p1141_p10, %p1135_p1 }
  0x51   : > { %1145 = shalt.err (!%p1142_p13)
}
  0x52   : > { %977 = dma.hbm_to_vmem [thread:$0]  (!%p1549_p7), %s195_s22, 128, %s198_s29, %s187_s27  }
  0x53   : > { %s1159_s18 = scalar_lea.vmem %s235_s13, 2048  ;;  %p1825_p5 = pneg %p1443_p4 }
  0x54   : > { %p1160_p11 = scmp.ne.s32.totalorder %s235_s13, %s1159_s18  ;;  %s1337_s12 = smov [#allocation7]  }
  0x55   : > { %s1164_s15 = sshll.u32 %s1337_s12, 4  ;;  %s1165_s15 = int_to_ptr.vmem [resolvable:$false] %s1164_s15 }
  0x56   : > { %p1162_p2 = pnand %p1160_p11, %p1825_p5  ;;  %s1166_s1 = scalar_lea.vmem %s1165_s15, 4096 }
  0x57   : > { %p1167_p0 = scmp.lt.s32.totalorder %s235_s13, %s1165_s15  ;;  %p1168_p12 = scmp.lt.s32.totalorder %s1166_s1, %s1159_s18 }
  0x58   : > { %p1163_p8 = pneg %p1162_p2 }
  0x59   : > { %p1169_p6 = por %p1168_p12, %p1167_p0 }
  0x5b   : > { %p1170_p1 = pnand %p1169_p6, %p1163_p8 }
  0x5d   : > { %1173 = shalt.err (!%p1170_p1)
}
  0x5e   : > { %s1826_s24 = smov 8   ;;  %s1827_s22 = smov 128  }
  0x5f   : > { %s1828_s7 = smov 256   ;;  %s807_s27 = sshll.u32 %s1322_s23, 11 }
  0x60   : > { %983 = dma.hbm_to_vmem [thread:$0]  (!%p1443_p4), %s1466_s14, 2048, %s235_s13, %s1448_s11, %s1828_s7, %s1827_s22, %s1826_s24  }
  0x61   : > { %s254_s4 = scalar_lea.hbm %s1778_s3, %s807_s27  ;;  %s248_s9 = scalar_lea.vmem [#allocation8], %s1434_s30 }
  0x62   : > { %s255_s10 = sshll.u32 %s248_s9, 4  ;;  %s1829_s18 = sand.u32 1, %s1298_s17   ;;  %s256_s10 = int_to_ptr.vmem [resolvable:$true] %s255_s10 }
  0x63   : > { %s245_s12 = scalar_lea.sflag [#allocation9], %s1829_s18  ;;  %s1187_s15 = scalar_lea.vmem %s256_s10, 2048 }
  0x64   : > { %p1188_p5 = scmp.ne.s32.totalorder %s256_s10, %s1187_s15  ;;  %p1830_p12 = pneg %p1443_p4 }
  0x65   : > { %s1338_s1 = smov [#allocation8]  }
  0x66   : > { %p1190_p11 = pnand %p1188_p5, %p1830_p12  ;;  %s1192_s0 = sshll.u32 %s1338_s1, 4  ;;  %s1193_s0 = int_to_ptr.vmem [resolvable:$false] %s1192_s0 }
  0x67   : > { %s1194_s11 = scalar_lea.vmem %s1193_s0, 4096  ;;  %p1195_p7 = scmp.lt.s32.totalorder %s256_s10, %s1193_s0 }
  0x68   : > { %p1191_p13 = pneg %p1190_p11  ;;  %p1196_p9 = scmp.lt.s32.totalorder %s1194_s11, %s1187_s15 }
  0x6a   : > { %p1197_p10 = por %p1196_p9, %p1195_p7 }
  0x6c   : > { %p1198_p2 = pnand %p1197_p10, %p1191_p13 }
  0x6e   : > { %1201 = shalt.err (!%p1198_p2)
}
  0x6f   : > { %986 = dma.hbm_to_vmem [thread:$0]  (!%p1443_p4), %s254_s4, 2048, %s256_s10, %s245_s12, %s1827_s22, %s1827_s22, %s1826_s24  }
  0x70   : > { %267 = sbr.rel (%p1470_p3) target bundleno = 623 (0x26f), region = 36  ;;  %s1586_s30 = sand.u32 (!%p1470_p3), 1, %s1306_s19  }
  0x71   : > { %s795_s0 = sshll.u32 (!%p1470_p3), %s1586_s30, 3  ;;  %s270_s14 = scalar_lea.sflag (!%p1470_p3), [#allocation3], %s1586_s30 }
  0x72   : > { %s1592_s13 = scalar_lea.vmem (!%p1470_p3), [#allocation2], %s795_s0  ;;  %p1831_p8 = scmp.ne.s32.totalorder (!%p1470_p3), %s1812_s6, 0 }
  0x75   : > { %1273 = dma.done.wait (%p1831_p8), %s270_s14, 128  }
  0x76   : > { %1275 = vsyncadd (%p1831_p8), %s270_s14, 4294967168  ;;  %s278_s8 = sand.u32 1, %s1475_s28   ;;  %s280_s5 = sand.u32 1, %s1294_s16  }
  0x77   : > { %s796_s24 = sshll.u32 %s280_s5, 7  ;;  %s279_s22 = scalar_lea.sflag [#allocation6], %s278_s8 }
  0x78   : > { %s1600_s7 = scalar_lea.vmem [#allocation5], %s796_s24  ;;  %p1832_p4 = scmp.ne.s32.totalorder %s1816_s2, 0 }
  0x7a   : > { %1277 = dma.done.wait (%p1832_p4), %s279_s22, 4096  }
  0x7b   : > { %1279 = vsyncadd (%p1832_p4), %s279_s22, 4294963200  ;;  %s1606_s27 = scalar_lea.vmem [#allocation7], %s796_s24  ;;  %s297_s26 = scalar_lea.sflag [#allocation9], %s280_s5 }
  0x7c   : > { %s1608_s6 = scalar_lea.vmem [#allocation8], %s796_s24 }
  0x7d   : > { %1281 = dma.done.wait (%p1832_p4), %s297_s26, 2048  }
  0x7e   : > { %1283 = vsyncadd (%p1832_p4), %s297_s26, 4294965248  ;;  %v1339_v0 = vmov 0.0   ;;  %vm1340_vm0 = vmmov 0   ;;  %v357_v1 = vld [vmem:[%s1600_s7 + $0x78] sm:$0xff]  ;;  %v356_v2 = vld [vmem:[%s1600_s7 + $0x70] sm:$0xff]  ;;  %s339_s2 = scalar_lea.vmem [#allocation10], %s795_s0 }
  0x7f   : > { %859 = vmatprep.subr.mxu0 %v1339_v0  ;;  %891 = vmatprep.mubr.msk.f32.mxu0 %vm1340_vm0, %v1339_v0  ;;  %v355_v3 = vld [vmem:[%s1600_s7 + $0x68] sm:$0xff]  ;;  %v354_v4 = vld [vmem:[%s1600_s7 + $0x60] sm:$0xff]  ;;  %v443_v5 = vld [vmem:[%s1606_s27 + $0x78] sm:$0xff]  ;;  %p801_p3 = scmp.ne.s32.totalorder %s1314_s21, 0 }
  0x80   : > { %894 = vmatprep.subr.mxu1 %v1339_v0  ;;  %926 = vmatprep.mubr.msk.f32.mxu1 %vm1340_vm0, %v1339_v0  ;;  %v353_v6 = vld [vmem:[%s1600_s7 + $0x58] sm:$0xff]  ;;  %v442_v7 = vld [vmem:[%s1606_s27 + $0x70] sm:$0xff]  ;;  %v441_v8 = vld [vmem:[%s1606_s27 + $0x68] sm:$0xff] }
  0x81   : > { %860 = vmatpush3.msra.mxu0 %v357_v1  ;;  %895 = vmatpush3.msra.mxu1 %v443_v5  ;;  %v352_v9 = vld [vmem:[%s1600_s7 + $0x50] sm:$0xff]  ;;  %v440_v10 = vld [vmem:[%s1606_s27 + $0x60] sm:$0xff]  ;;  %v351_v11 = vld [vmem:[%s1600_s7 + $0x48] sm:$0xff] }
  0x82   : > { %861 = vmatprep.subr.mxu0 %v1339_v0  ;;  %896 = vmatprep.subr.mxu1 %v1339_v0  ;;  %v439_v12 = vld [vmem:[%s1606_s27 + $0x58] sm:$0xff]  ;;  %v350_v13 = vld [vmem:[%s1600_s7 + $0x40] sm:$0xff]  ;;  %v438_v14 = vld [vmem:[%s1606_s27 + $0x50] sm:$0xff] }
  0x83   : > { %862 = vmatpush3.msra.mxu0 %v356_v2  ;;  %897 = vmatpush3.msra.mxu1 %v442_v7  ;;  %v349_v15 = vld [vmem:[%s1600_s7 + $0x38] sm:$0xff]  ;;  %v437_v16 = vld [vmem:[%s1606_s27 + $0x48] sm:$0xff]  ;;  %v348_v17 = vld [vmem:[%s1600_s7 + $0x30] sm:$0xff] }
  0x84   : > { %863 = vmatprep.subr.mxu0 %v1339_v0  ;;  %898 = vmatprep.subr.mxu1 %v1339_v0  ;;  %v436_v18 = vld [vmem:[%s1606_s27 + $0x40] sm:$0xff]  ;;  %v347_v19 = vld [vmem:[%s1600_s7 + $0x28] sm:$0xff]  ;;  %v435_v20 = vld [vmem:[%s1606_s27 + $0x38] sm:$0xff] }
  0x85   : > { %864 = vmatpush3.msra.mxu0 %v355_v3  ;;  %899 = vmatpush3.msra.mxu1 %v441_v8  ;;  %v346_v21 = vld [vmem:[%s1600_s7 + $0x20] sm:$0xff]  ;;  %v434_v22 = vld [vmem:[%s1606_s27 + $0x30] sm:$0xff]  ;;  %v345_v23 = vld [vmem:[%s1600_s7 + $0x18] sm:$0xff] }
  0x86   : > { %865 = vmatprep.subr.mxu0 %v1339_v0  ;;  %900 = vmatprep.subr.mxu1 %v1339_v0  ;;  %v433_v24 = vld [vmem:[%s1606_s27 + $0x28] sm:$0xff]  ;;  %v344_v25 = vld [vmem:[%s1600_s7 + $0x10] sm:$0xff]  ;;  %v432_v26 = vld [vmem:[%s1606_s27 + $0x20] sm:$0xff] }
  0x87   : > { %866 = vmatpush3.msra.mxu0 %v354_v4  ;;  %901 = vmatpush3.msra.mxu1 %v440_v10  ;;  %v343_v27 = vld [vmem:[%s1600_s7 + $0x8] sm:$0xff]  ;;  %v431_v28 = vld [vmem:[%s1606_s27 + $0x18] sm:$0xff]  ;;  %v342_v29 = vld [vmem:[%s1600_s7] sm:$0xff] }
  0x88   : > { %867 = vmatprep.subr.mxu0 %v1339_v0  ;;  %902 = vmatprep.subr.mxu1 %v1339_v0  ;;  %v341_v30 = vld [vmem:[%s1592_s13] sm:$0xff]  ;;  %v429_v32 = vld [vmem:[%s1606_s27 + $0x8] sm:$0xff]  ;;  %v428_v33 = vld [vmem:[%s1606_s27] sm:$0xff] }
  0x89   : > { %868 = vmatpush3.msra.mxu0 %v353_v6  ;;  %903 = vmatpush3.msra.mxu1 %v439_v12  ;;  %v430_v31 = vld [vmem:[%s1606_s27 + $0x10] sm:$0xff]  ;;  %v537_v34 = vld [vmem:[%s1608_s6 + $0x78] sm:$0xff]  ;;  %v535_v36 = vld [vmem:[%s1608_s6 + $0x68] sm:$0xff] }
  0x8a   : > { %869 = vmatprep.subr.mxu0 %v1339_v0  ;;  %904 = vmatprep.subr.mxu1 %v1339_v0  ;;  %v536_v35 = vld [vmem:[%s1608_s6 + $0x70] sm:$0xff]  ;;  %v534_v37 = vld [vmem:[%s1608_s6 + $0x60] sm:$0xff]  ;;  %v533_v38 = vld [vmem:[%s1608_s6 + $0x58] sm:$0xff] }
  0x8b   : > { %870 = vmatpush3.msra.mxu0 %v352_v9  ;;  %905 = vmatpush3.msra.mxu1 %v438_v14  ;;  %v532_v39 = vld [vmem:[%s1608_s6 + $0x50] sm:$0xff]  ;;  %v531_v40 = vld [vmem:[%s1608_s6 + $0x48] sm:$0xff]  ;;  %v530_v41 = vld [vmem:[%s1608_s6 + $0x40] sm:$0xff] }
  0x8c   : > { %871 = vmatprep.subr.mxu0 %v1339_v0  ;;  %906 = vmatprep.subr.mxu1 %v1339_v0  ;;  %v529_v42 = vld [vmem:[%s1608_s6 + $0x38] sm:$0xff]  ;;  %v528_v43 = vld [vmem:[%s1608_s6 + $0x30] sm:$0xff]  ;;  %v527_v44 = vld [vmem:[%s1608_s6 + $0x28] sm:$0xff] }
  0x8d   : > { %872 = vmatpush3.msra.mxu0 %v351_v11  ;;  %907 = vmatpush3.msra.mxu1 %v437_v16  ;;  %v526_v45 = vld [vmem:[%s1608_s6 + $0x20] sm:$0xff]  ;;  %v525_v46 = vld [vmem:[%s1608_s6 + $0x18] sm:$0xff]  ;;  %v524_v47 = vld [vmem:[%s1608_s6 + $0x10] sm:$0xff] }
  0x8e   : > { %873 = vmatprep.subr.mxu0 %v1339_v0  ;;  %908 = vmatprep.subr.mxu1 %v1339_v0  ;;  %v523_v48 = vld [vmem:[%s1608_s6 + $0x8] sm:$0xff]  ;;  %v522_v49 = vld [vmem:[%s1608_s6] sm:$0xff] }
  0x8f   : > { %874 = vmatpush3.msra.mxu0 %v350_v13  ;;  %909 = vmatpush3.msra.mxu1 %v436_v18 }
  0x90   : > { %875 = vmatprep.subr.mxu0 %v1339_v0  ;;  %910 = vmatprep.subr.mxu1 %v1339_v0 }
  0x91   : > { %876 = vmatpush3.msra.mxu0 %v349_v15  ;;  %911 = vmatpush3.msra.mxu1 %v435_v20 }
  0x92   : > { %877 = vmatprep.subr.mxu0 %v1339_v0  ;;  %912 = vmatprep.subr.mxu1 %v1339_v0 }
  0x93   : > { %878 = vmatpush3.msra.mxu0 %v348_v17  ;;  %913 = vmatpush3.msra.mxu1 %v434_v22 }
  0x94   : > { %879 = vmatprep.subr.mxu0 %v1339_v0  ;;  %914 = vmatprep.subr.mxu1 %v1339_v0 }
  0x95   : > { %880 = vmatpush3.msra.mxu0 %v347_v19  ;;  %915 = vmatpush3.msra.mxu1 %v433_v24 }
  0x96   : > { %881 = vmatprep.subr.mxu0 %v1339_v0  ;;  %916 = vmatprep.subr.mxu1 %v1339_v0 }
  0x97   : > { %882 = vmatpush3.msra.mxu0 %v346_v21  ;;  %917 = vmatpush3.msra.mxu1 %v432_v26 }
  0x98   : > { %883 = vmatprep.subr.mxu0 %v1339_v0  ;;  %918 = vmatprep.subr.mxu1 %v1339_v0 }
  0x99   : > { %884 = vmatpush3.msra.mxu0 %v345_v23  ;;  %919 = vmatpush3.msra.mxu1 %v431_v28 }
  0x9a   : > { %885 = vmatprep.subr.mxu0 %v1339_v0  ;;  %920 = vmatprep.subr.mxu1 %v1339_v0 }
  0x9b   : > { %886 = vmatpush3.msra.mxu0 %v344_v25  ;;  %921 = vmatpush3.msra.mxu1 %v430_v31 }
  0x9c   : > { %887 = vmatprep.subr.mxu0 %v1339_v0  ;;  %922 = vmatprep.subr.mxu1 %v1339_v0 }
  0x9d   : > { %888 = vmatpush3.msra.mxu0 %v343_v27  ;;  %923 = vmatpush3.msra.mxu1 %v429_v32 }
  0x9e   : > { %889 = vmatprep.subr.mxu0 %v1339_v0  ;;  %924 = vmatprep.subr.mxu1 %v1339_v0 }
  0x9f   : > { %890 = vmatpush3.msra.mxu0 %v342_v29  ;;  %925 = vmatpush3.msra.mxu1 %v428_v33 }
  0xa0   : > { %892 = vmatmul.mubr.f32.vlgmr.msra.gmra.mxu0 %v341_v30  ;;  %929 = vmatprep.subr.mxu0 %v1339_v0 }
  0xa1   : > { %961 = vmatprep.mubr.msk.f32.mxu0 %vm1340_vm0, %v1339_v0  ;;  %927 = vmatmul.mubr.f32.vlgmr.msra.gmra.mxu1 %v341_v30 }
  0xa2   : > { %930 = vmatpush3.msra.mxu0 %v537_v34 }
  0xa3   : > { %931 = vmatprep.subr.mxu0 %v1339_v0 }
  0xa4   : > { %932 = vmatpush3.msra.mxu0 %v536_v35 }
  0xa5   : > { %933 = vmatprep.subr.mxu0 %v1339_v0 }
  0xa6   : > { %934 = vmatpush3.msra.mxu0 %v535_v36 }
  0xa7   : > { %935 = vmatprep.subr.mxu0 %v1339_v0 }
  0xa8   : > { %936 = vmatpush3.msra.mxu0 %v534_v37 }
  0xa9   : > { %937 = vmatprep.subr.mxu0 %v1339_v0 }
  0xaa   : > { %938 = vmatpush3.msra.mxu0 %v533_v38 }
  0xab   : > { %939 = vmatprep.subr.mxu0 %v1339_v0 }
  0xac   : > { %940 = vmatpush3.msra.mxu0 %v532_v39 }
  0xad   : > { %941 = vmatprep.subr.mxu0 %v1339_v0 }
  0xae   : > { %942 = vmatpush3.msra.mxu0 %v531_v40 }
  0xaf   : > { %943 = vmatprep.subr.mxu0 %v1339_v0 }
  0xb0   : > { %944 = vmatpush3.msra.mxu0 %v530_v41 }
  0xb1   : > { %945 = vmatprep.subr.mxu0 %v1339_v0 }
  0xb2   : > { %946 = vmatpush3.msra.mxu0 %v529_v42 }
  0xb3   : > { %947 = vmatprep.subr.mxu0 %v1339_v0 }
  0xb4   : > { %948 = vmatpush3.msra.mxu0 %v528_v43 }
  0xb5   : > { %949 = vmatprep.subr.mxu0 %v1339_v0 }
  0xb6   : > { %950 = vmatpush3.msra.mxu0 %v527_v44 }
  0xb7   : > { %951 = vmatprep.subr.mxu0 %v1339_v0 }
  0xb8   : > { %952 = vmatpush3.msra.mxu0 %v526_v45 }
  0xb9   : > { %953 = vmatprep.subr.mxu0 %v1339_v0 }
  0xba   : > { %954 = vmatpush3.msra.mxu0 %v525_v46 }
  0xbb   : > { %955 = vmatprep.subr.mxu0 %v1339_v0 }
  0xbc   : > { %956 = vmatpush3.msra.mxu0 %v524_v47 }
  0xbd   : > { %957 = vmatprep.subr.mxu0 %v1339_v0 }
  0xbe   : > { %958 = vmatpush3.msra.mxu0 %v523_v48 }
  0xbf   : > { %959 = vmatprep.subr.mxu0 %v1339_v0 }
  0xc0   : > { %960 = vmatpush3.msra.mxu0 %v522_v49 }
 0x160   : > { %v424_v50 = vpop.f32.mrf.mxu0 }
 0x161   : > { %v800_v51 = vmul.f32 -1.442695, %v424_v50  ;;  %v510_v53 = vpop.f32.mrf.mxu1 }
 0x162   : > { %v893_v52 = vpop.f32.mrf.mxu0 }
 0x163   : > { %1086 = vpow2.f32 %v800_v51  ;;  %v928_v54 = vpop.f32.mrf.mxu1 }
 0x170   : > { %v1087_v55 = vpop.eup %1086 }
 0x171   : > { %v517_v56 = vadd.f32 1.0, %v1087_v55 }
 0x173   : > { %1088 = vrcp.f32 %v517_v56 }
 0x180   : > { %v1089_v57 = vpop.eup %1088 }
 0x181   : > { %v520_v58 = vmul.f32 %v1089_v57, %v424_v50 }
 0x183   : > { %v521_v59 = vmul.f32 %v520_v58, %v510_v53 }
 0x185   : > { %962 = vmatmul.mubr.f32.vlgmr.msra.gmra.mxu0 %v521_v59 }
 0x243   : > { %611 = sbr.rel (%p801_p3) target bundleno = 585 (0x249), region = 56 }
 0x245   : > { %v604_v60 = vpop.f32.mrf.mxu0 }
 0x247   : > { %v963_v61 = vpop.f32.mrf.mxu0 }
 0x248   : > { %612 = vst [vmem:[%s339_s2] sm:$0xff] %v604_v60 }
 0x249 PF: > { %p802_p0 = scmp.le.s32.totalorder %s1314_s21, 0 }
 0x24b   : > { %616 = sbr.rel (%p802_p0) target bundleno = 596 (0x254), region = 60 }
 0x250   : > { %v617_v62 = vld [vmem:[%s339_s2] sm:$0xff] }
 0x251   : > { %v618_v63 = vadd.f32 %v617_v62, %v604_v60 }
 0x253   : > { %619 = vst [vmem:[%s339_s2] sm:$0xff] %v618_v63 }
 0x254 PF: > { %s1833_s28 = sld [smem:[#allocation16_spill]]  ;;  %s634_s1 = sshll.u32 %s339_s2, 4  ;;  %s635_s1 = int_to_ptr.vmem [resolvable:$true] %s634_s1 }
 0x255   : > { %s1834_s29 = sld [smem:[#allocation22_spill]]  ;;  %s621_s11 = scalar_lea.sflag [#allocation4], %s1586_s30 }
 0x256   : > { %s1835_s18 = sld [smem:[#allocation27_spill]]  ;;  %s1202_s0 = scalar_lea.vmem %s635_s1, 128 }
 0x257   : > { %p1203_p6 = scmp.ne.s32.totalorder %s635_s1, %s1202_s0  ;;  %s1341_s21 = smov [#allocation10]  }
 0x258   : > { %s1206_s14 = sshll.u32 %s1341_s21, 4  ;;  %s1207_s14 = int_to_ptr.vmem [resolvable:$false] %s1206_s14 }
 0x259   : > { %s1208_s13 = scalar_lea.vmem %s1207_s14, 256  ;;  %p1209_p11 = scmp.lt.s32.totalorder %s635_s1, %s1207_s14 }
 0x25a   : > { %s804_s4 = sshll.u32 %s1833_s28, 7  ;;  %p1210_p13 = scmp.lt.s32.totalorder %s1208_s13, %s1202_s0 }
 0x25b   : > { %p1837_p1 = scmp.ne.s32.totalorder %s1834_s29, 0 }
 0x25c   : > { %s1836_s12 = smov %s1835_s18  ;;  %s632_s15 = scalar_lea.hbm %s1835_s18, %s804_s4 }
 0x25d   : > { %p1204_p5 = pnand %p1203_p6, %p1837_p1  ;;  %p1211_p7 = por %p1210_p13, %p1209_p11 }
 0x25f   : > { %p1205_p12 = pneg %p1204_p5 }
 0x261   : > { %p1212_p9 = pnand %p1211_p7, %p1205_p12 }
 0x263   : > { %1215 = shalt.err (!%p1212_p9)
}
 0x264   : > { %s1216_s8 = scalar_lea.hbm %s632_s15, 128  ;;  %s1220_s24 = scalar_lea.hbm %s1836_s12, 256 }
 0x265   : > { %p1217_p10 = scmp.ne.s32.totalorder %s632_s15, %s1216_s8  ;;  %p1221_p4 = scmp.lt.s32.totalorder %s632_s15, %s1836_s12 }
 0x266   : > { %p1222_p3 = scmp.lt.s32.totalorder %s1220_s24, %s1216_s8 }
 0x267   : > { %p1218_p2 = pnand %p1217_p10, %p1837_p1 }
 0x268   : > { %p1223_p0 = por %p1222_p3, %p1221_p4 }
 0x269   : > { %p1219_p8 = pneg %p1218_p2 }
 0x26b   : > { %p1224_p6 = pnand %p1223_p0, %p1219_p8 }
 0x26d   : > { %1227 = shalt.err (!%p1224_p6)
}
 0x26e   : > { %972 = dma.vmem_to_hbm [thread:$0]  (%p1837_p1), %s635_s1, 128, %s632_s15, %s621_s11  }
 0x26f PF: > { %s1838_s27 = sld [smem:[#allocation15_spill]]  ;;  %p992_p5 = scmp.ge.s32.totalorder %s1330_s25, 2 }
 0x270   : > { %s1839_s26 = sld [smem:[#allocation23_spill]] }
 0x275   : > { %s646_s6 = sand.u32 1, %s1838_s27  }
 0x276   : > { %p1840_p12 = scmp.ne.s32.totalorder %s1839_s26, 0  ;;  %s647_s2 = scalar_lea.sflag [#allocation4], %s646_s6 }
 0x278   : > { %p988_p11 = pnand %p992_p5, %p1840_p12 }
 0x27a   : > { %p989_p13 = pneg %p988_p11 }
 0x27c   : > { %1285 = dma.done.wait (%p989_p13), %s647_s2, 128  }
 0x27d   : > { %1287 = vsyncadd (%p989_p13), %s647_s2, 4294967168  ;;  %s26_s25 = sadd.s32 1, %s1330_s25   ;;  %s1841_s28 = sld [smem:[#allocation20_spill]] }
 0x27e   : > { %p23_p7 = scmp.ge.s32.totalorder %s26_s25, 6   ;;  %s1842_s29 = sld [smem:[#allocation21_spill]] }
 0x27f   : > { %s1843_s22 = sld [smem:[#allocation17_spill]]  ;;  %s1846_s15 = smov %s1294_s16 }
 0x280   : > { %s1844_s4 = sld [smem:[#allocation18_spill]]  ;;  %s1847_s16 = smov %s1298_s17 }
 0x281   : > { %s1845_s24 = sld [smem:[#allocation19_spill]]  ;;  %s1849_s18 = smov %s1306_s19 }
 0x282   : > { %s1850_s19 = smov %s1310_s20  ;;  %s1852_s21 = smov %s1322_s23 }
 0x283   : > { %s1848_s17 = smov %s1841_s28  ;;  %25 = sbr.rel (!%p23_p7) target bundleno = 18 (0x12), region = 126 }
 0x284   : > { %s1851_s20 = smov %s1842_s29 }
 0x286   : > { %s1853_s23 = smov %s1844_s4 }
 0x288   :  { %652 = vsyncpa [#allocation3], 1 }
 0x289   :  { %654 = vsyncpa [#allocation3 + $0x1], 1 }
 0x28a   :  { %655 = vsyncpa [#allocation6], 1 }
 0x28b   :  { %657 = vsyncpa [#allocation6 + $0x1], 1 }
 0x28c   :  { %658 = vsyncpa [#allocation9], 1 }
 0x28d   :  { %660 = vsyncpa [#allocation9 + $0x1], 1 }
 0x28e   :  { %661 = vsyncpa [#allocation4], 1 }
 0x28f   :  { %663 = vsyncpa [#allocation4 + $0x1], 1 }

</bundles_post_ra>
